<compile_context>
chip_gen: v6e
topology: v6e:2x2x1
jax: 0.10.0
libtpu: 0.0.40
codegen_flags: <defaults>
</compile_context>

<pallas_src>
import functools

import jax
import jax.numpy as jnp
from jax.experimental import pallas as pl
from jax.experimental.pallas import tpu as pltpu

# ---- small, module-consistent hyperparameters (scaled down from 512/256) ----
N_EMBD = 32
NUM_HEADS = 4
HEAD_SIZE = 8          # head_size * num_heads == n_embd, as in the module
BATCH = 2
SEQ = 8                # T <= block_size


# ----------------------------- Pallas kernel ---------------------------------
def mha_fused_kernel(x_ref, wqkv_ref, wproj_ref, bproj_ref, o_ref, qkv_ref,
                     *, B, T, H, D):
    """Whole batch in one step: QKV proj -> per-(batch, head) causal attention
    -> per-head accumulation into the projected output (+bias).

    x_ref:     (B*T, C)       all batch rows, flattened
    wqkv_ref:  (C, H*3*D)     head-contiguous [Wq_h | Wk_h | Wv_h], pre-transposed
    wproj_ref: (H*D, C)       output projection weight, pre-transposed
    bproj_ref: (1, C)         output projection bias
    o_ref:     (B*T, C)       output slab (doubles as the f32 VMEM accumulator)
    qkv_ref:   (B*T, H*3*D)   VMEM scratch holding the QKV projection
    """
    C = o_ref.shape[1]
    BT = B * T
    scale = 1.0 / (D ** 0.5)

    # One MXU matmul produces Q, K and V for every head and every batch row.
    qkv_ref[...] = jnp.dot(x_ref[...], wqkv_ref[...],
                           preferred_element_type=jnp.float32)       # (B*T, 3*H*D)

    # Causal mask for one batch element (hoisted out of the loops).
    row = jax.lax.broadcasted_iota(jnp.int32, (T, T), 0)
    col = jax.lax.broadcasted_iota(jnp.int32, (T, T), 1)
    causal = col <= row

    # Bias added once; heads then accumulate straight into the output VMEM slab
    # (no head concat, no final (T,HD)@(HD,C) matmul, no H live head outputs).
    o_ref[...] = jnp.broadcast_to(bproj_ref[...], (BT, C))

    # Static unrolled loops: B*H = 8 tiny iterations, everything stays in VMEM/vregs.
    for b in range(B):
        r0 = b * T
        for h in range(H):
            c0 = h * 3 * D
            # Narrow Ref-sliced loads (head-contiguous layout) — no lane-extracts
            # from a live (B*T, 3*H*D) value.
            qh = qkv_ref[r0:r0 + T, c0:c0 + D] * scale     # scale q (T*D muls), not (T,T) scores
            kh = qkv_ref[r0:r0 + T, c0 + D:c0 + 2 * D]
            vh = qkv_ref[r0:r0 + T, c0 + 2 * D:c0 + 3 * D]

            # q @ k^T without materializing a transpose (contract dim 1 of both).
            s = jax.lax.dot_general(
                qh, kh, (((1,), (1,)), ((), ())),
                preferred_element_type=jnp.float32)                  # (T, T)
            s = jnp.where(causal, s, -jnp.inf)                       # causal mask
            m = jnp.max(s, axis=-1, keepdims=True)
            p = jnp.exp(s - m)
            # EUP reciprocal + multiply instead of a VALU divide.
            p = p * pl.reciprocal(jnp.sum(p, axis=-1, keepdims=True), approx=False)
            out_h = jnp.dot(p, vh, preferred_element_type=jnp.float32)  # (T, D)

            # Per-head accumulation into the projection (VMEM accumulator).
            o_ref[r0:r0 + T, :] += jnp.dot(
                out_h, wproj_ref[h * D:(h + 1) * D, :],
                preferred_element_type=jnp.float32)


# ------------------------------ wrapper --------------------------------------
def multi_head_attention(x, params):
    """x: (B, T, C). Returns (B, T, C) float32. Mirrors MultiHeadAttention.forward."""
    B, T, C = x.shape
    H, D = NUM_HEADS, HEAD_SIZE

    # Layout plumbing done ONCE outside the kernel (not per grid step):
    #  * stack QKV weights head-contiguously ([Wq_h|Wk_h|Wv_h] per head) and
    #    pre-transpose so the kernel never transposes;
    #  * flatten x to a single (B*T, C) slab (contiguity-preserving reshape).
    wq_t = params["wq"].T.reshape(C, H, D)
    wk_t = params["wk"].T.reshape(C, H, D)
    wv_t = params["wv"].T.reshape(C, H, D)
    w_qkv_t = jnp.concatenate([wq_t, wk_t, wv_t], axis=-1) \
                 .reshape(C, 3 * H * D).astype(jnp.float32)           # (C, H*3*D)
    w_proj_t = params["w_proj"].T.astype(jnp.float32)                 # (H*D, C)
    b_proj = params["b_proj"].reshape(1, C).astype(jnp.float32)       # (1, C)
    x2d = x.reshape(B * T, C).astype(jnp.float32)                     # (B*T, C)

    kernel = functools.partial(mha_fused_kernel, B=B, T=T, H=H, D=D)

    out2d = pl.pallas_call(
        kernel,
        out_shape=jax.ShapeDtypeStruct((B * T, C), jnp.float32),
        grid=(1,),                                    # single step: whole batch per step
        in_specs=[
            pl.BlockSpec((B * T, C), lambda i: (0, 0)),
            pl.BlockSpec((C, 3 * H * D), lambda i: (0, 0)),
            pl.BlockSpec((H * D, C), lambda i: (0, 0)),
            pl.BlockSpec((1, C), lambda i: (0, 0)),
        ],
        out_specs=pl.BlockSpec((B * T, C), lambda i: (0, 0)),
        scratch_shapes=[pltpu.VMEM((B * T, 3 * H * D), jnp.float32)],
    )(x2d, w_qkv_t, w_proj_t, b_proj)

    return out2d.reshape(B, T, C)


# ------------------------------ reference ------------------------------------
def reference(x, params):
    B, T, C = x.shape
    H, D = NUM_HEADS, HEAD_SIZE
    q = (x @ params["wq"].T).reshape(B, T, H, D).transpose(0, 2, 1, 3)
    k = (x @ params["wk"].T).reshape(B, T, H, D).transpose(0, 2, 1, 3)
    v = (x @ params["wv"].T).reshape(B, T, H, D).transpose(0, 2, 1, 3)
    s = jnp.einsum("bhqd,bhkd->bhqk", q, k) / (D ** 0.5)
    mask = jnp.tril(jnp.ones((T, T), bool))
    s = jnp.where(mask, s, -jnp.inf)
    p = jax.nn.softmax(s, axis=-1)
    o = jnp.einsum("bhqk,bhkd->bhqd", p, v)
    o = o.transpose(0, 2, 1, 3).reshape(B, T, H * D)
    return o @ params["w_proj"].T + params["b_proj"]


# ------------------------------ main ------------------------------------------
def init_params(key):
    """Deterministic init; PyTorch nn.Linear-style uniform(-1/sqrt(fan_in), ...)."""
    ks = jax.random.split(key, 5)
    bound_qkv = 1.0 / (N_EMBD ** 0.5)
    hd = NUM_HEADS * HEAD_SIZE
    bound_proj = 1.0 / (hd ** 0.5)
    u = lambda k, shape, b: jax.random.uniform(k, shape, jnp.float32, -b, b)
    return {
        "wq": u(ks[0], (hd, N_EMBD), bound_qkv),
        "wk": u(ks[1], (hd, N_EMBD), bound_qkv),
        "wv": u(ks[2], (hd, N_EMBD), bound_qkv),
        "w_proj": u(ks[3], (N_EMBD, hd), bound_proj),
        "b_proj": u(ks[4], (N_EMBD,), bound_proj),
    }


if __name__ == "__main__":
    key = jax.random.PRNGKey(0)
    k_x, k_p = jax.random.split(key)
    x = jax.random.normal(k_x, (BATCH, SEQ, N_EMBD), jnp.float32)
    params = init_params(k_p)

    out = multi_head_attention(x, params)
    out = jax.block_until_ready(out)

    ref = reference(x, params)
    assert out.shape == (BATCH, SEQ, N_EMBD)
    assert jnp.allclose(out, ref, atol=1e-4, rtol=1e-4), "mismatch vs reference"

    print("KERNEL_OK")
</pallas_src>

<mosaic_0001>
module attributes {stable_mosaic.version = 11 : i64} {
  func.func @mha_fused_kernel(%arg0: i32, %arg1: memref<16x32xf32, #tpu.memory_space<vmem>>, %arg2: memref<32x96xf32, #tpu.memory_space<vmem>>, %arg3: memref<32x32xf32, #tpu.memory_space<vmem>>, %arg4: memref<1x32xf32, #tpu.memory_space<vmem>>, %arg5: memref<16x32xf32, #tpu.memory_space<vmem>>, %arg6: memref<16x96xf32, #tpu.memory_space<vmem>>) attributes {dimension_semantics = [#tpu.dimension_semantics<arbitrary>], iteration_bounds = array<i64: 1>, scalar_prefetch = 0 : i64, scratch_operands = 1 : i64, tpu.core_type = #tpu.core_type<tc>, window_params = [{pipeline_mode = #tpu.pipeline_mode<synchronous>, transform_indices = @transform_0, window_bounds = array<i64: 16, 32>}, {pipeline_mode = #tpu.pipeline_mode<synchronous>, transform_indices = @transform_1, window_bounds = array<i64: 32, 96>}, {pipeline_mode = #tpu.pipeline_mode<synchronous>, transform_indices = @transform_2, window_bounds = array<i64: 32, 32>}, {pipeline_mode = #tpu.pipeline_mode<synchronous>, transform_indices = @transform_3, window_bounds = array<i64: 1, 32>}, {pipeline_mode = #tpu.pipeline_mode<synchronous>, transform_indices = @transform_4, window_bounds = array<i64: 16, 32>}]} {
    %c0 = arith.constant 0 : index
    %c0_0 = arith.constant 0 : index
    %0 = vector.load %arg1[%c0, %c0_0] : memref<16x32xf32, #tpu.memory_space<vmem>>, vector<16x32xf32>
    %c0_1 = arith.constant 0 : index
    %c0_2 = arith.constant 0 : index
    %1 = vector.load %arg2[%c0_1, %c0_2] : memref<32x96xf32, #tpu.memory_space<vmem>>, vector<32x96xf32>
    %cst = arith.constant dense<0.000000e+00> : vector<16x96xf32>
    %2 = tpu.matmul %0, %1, %cst {dimension_numbers = #tpu.dot_dimension_numbers<[1], [0], [0], [1], [0, 0, 1, 1], [], []>} : vector<16x32xf32>, vector<32x96xf32>, vector<16x96xf32> -> vector<16x96xf32>
    %c0_3 = arith.constant 0 : index
    %c0_4 = arith.constant 0 : index
    %3 = vector.load %arg6[%c0_3, %c0_4] : memref<16x96xf32, #tpu.memory_space<vmem>>, vector<16x96xf32>
    tpu.vector_store %arg6[%c0_3, %c0_4], %2 {strides = array<i32>} : memref<16x96xf32, #tpu.memory_space<vmem>>, vector<16x96xf32>,
    %4 = tpu.iota {dimensions = array<i32: 0>} : vector<8x8xi32>
    %5 = tpu.iota {dimensions = array<i32: 1>} : vector<8x8xi32>
    %6 = arith.cmpi sle, %5, %4 : vector<8x8xi32>
    %c0_5 = arith.constant 0 : index
    %c0_6 = arith.constant 0 : index
    %7 = vector.load %arg4[%c0_5, %c0_6] : memref<1x32xf32, #tpu.memory_space<vmem>>, vector<1x32xf32>
    %8 = vector.shape_cast %7 : vector<1x32xf32> to vector<1x32xf32>
    %9 = vector.broadcast %8 : vector<1x32xf32> to vector<16x32xf32>
    %c0_7 = arith.constant 0 : index
    %c0_8 = arith.constant 0 : index
    %10 = vector.load %arg5[%c0_7, %c0_8] : memref<16x32xf32, #tpu.memory_space<vmem>>, vector<16x32xf32>
    tpu.vector_store %arg5[%c0_7, %c0_8], %9 {strides = array<i32>} : memref<16x32xf32, #tpu.memory_space<vmem>>, vector<16x32xf32>,
    %c0_9 = arith.constant 0 : index
    %c0_10 = arith.constant 0 : index
    %11 = vector.load %arg6[%c0_9, %c0_10] : memref<16x96xf32, #tpu.memory_space<vmem>>, vector<8x8xf32>
    %cst_11 = arith.constant 0.353553385 : f32
    %12 = vector.broadcast %cst_11 : f32 to vector<8x8xf32>
    %13 = arith.mulf %11, %12 : vector<8x8xf32>
    %c0_12 = arith.constant 0 : index
    %c8 = arith.constant 8 : index
    %14 = vector.load %arg6[%c0_12, %c8] : memref<16x96xf32, #tpu.memory_space<vmem>>, vector<8x8xf32>
    %c0_13 = arith.constant 0 : index
    %c16 = arith.constant 16 : index
    %15 = vector.load %arg6[%c0_13, %c16] : memref<16x96xf32, #tpu.memory_space<vmem>>, vector<8x8xf32>
    %cst_14 = arith.constant dense<0.000000e+00> : vector<8x8xf32>
    %16 = tpu.matmul %13, %14, %cst_14 {dimension_numbers = #tpu.dot_dimension_numbers<[1], [1], [0], [0], [0, 0, 1, 0], [], []>} : vector<8x8xf32>, vector<8x8xf32>, vector<8x8xf32> -> vector<8x8xf32>
    %cst_15 = arith.constant 0xFF800000 : f32
    %17 = vector.broadcast %cst_15 : f32 to vector<8x8xf32>
    %18 = arith.select %6, %16, %17 : vector<8x8xi1>, vector<8x8xf32>
    %cst_16 = arith.constant dense<0xFF800000> : vector<8xf32>
    %19 = vector.multi_reduction <maximumf>, %18, %cst_16 [1] : vector<8x8xf32> to vector<8xf32>
    %20 = vector.shape_cast %19 : vector<8xf32> to vector<8x1xf32>
    %21 = vector.broadcast %20 : vector<8x1xf32> to vector<8x8xf32>
    %22 = arith.subf %18, %21 : vector<8x8xf32>
    %23 = math.exp %22 : vector<8x8xf32>
    %cst_17 = arith.constant dense<0.000000e+00> : vector<8xf32>
    %24 = vector.multi_reduction <add>, %23, %cst_17 [1] : vector<8x8xf32> to vector<8xf32>
    %25 = vector.shape_cast %24 : vector<8xf32> to vector<8x1xf32>
    %26 = tpu.reciprocal %25 : vector<8x1xf32> -> vector<8x1xf32>
    %27 = vector.broadcast %26 : vector<8x1xf32> to vector<8x8xf32>
    %28 = arith.mulf %23, %27 : vector<8x8xf32>
    %cst_18 = arith.constant dense<0.000000e+00> : vector<8x8xf32>
    %29 = tpu.matmul %28, %15, %cst_18 {dimension_numbers = #tpu.dot_dimension_numbers<[1], [0], [0], [1], [0, 0, 1, 1], [], []>} : vector<8x8xf32>, vector<8x8xf32>, vector<8x8xf32> -> vector<8x8xf32>
    %c0_19 = arith.constant 0 : index
    %c0_20 = arith.constant 0 : index
    %30 = vector.load %arg5[%c0_19, %c0_20] : memref<16x32xf32, #tpu.memory_space<vmem>>, vector<8x32xf32>
    %c0_21 = arith.constant 0 : index
    %c0_22 = arith.constant 0 : index
    %31 = vector.load %arg3[%c0_21, %c0_22] : memref<32x32xf32, #tpu.memory_space<vmem>>, vector<8x32xf32>
    %cst_23 = arith.constant dense<0.000000e+00> : vector<8x32xf32>
    %32 = tpu.matmul %29, %31, %cst_23 {dimension_numbers = #tpu.dot_dimension_numbers<[1], [0], [0], [1], [0, 0, 1, 1], [], []>} : vector<8x8xf32>, vector<8x32xf32>, vector<8x32xf32> -> vector<8x32xf32>
    %33 = arith.addf %30, %32 : vector<8x32xf32>
    %c0_24 = arith.constant 0 : index
    %c0_25 = arith.constant 0 : index
    %34 = vector.load %arg5[%c0_24, %c0_25] : memref<16x32xf32, #tpu.memory_space<vmem>>, vector<8x32xf32>
    tpu.vector_store %arg5[%c0_24, %c0_25], %33 {strides = array<i32>} : memref<16x32xf32, #tpu.memory_space<vmem>>, vector<8x32xf32>,
    %c0_26 = arith.constant 0 : index
    %c24 = arith.constant 24 : index
    %35 = vector.load %arg6[%c0_26, %c24] : memref<16x96xf32, #tpu.memory_space<vmem>>, vector<8x8xf32>
    %cst_27 = arith.constant 0.353553385 : f32
    %36 = vector.broadcast %cst_27 : f32 to vector<8x8xf32>
    %37 = arith.mulf %35, %36 : vector<8x8xf32>
    %c0_28 = arith.constant 0 : index
    %c32 = arith.constant 32 : index
    %38 = vector.load %arg6[%c0_28, %c32] : memref<16x96xf32, #tpu.memory_space<vmem>>, vector<8x8xf32>
    %c0_29 = arith.constant 0 : index
    %c40 = arith.constant 40 : index
    %39 = vector.load %arg6[%c0_29, %c40] : memref<16x96xf32, #tpu.memory_space<vmem>>, vector<8x8xf32>
    %cst_30 = arith.constant dense<0.000000e+00> : vector<8x8xf32>
    %40 = tpu.matmul %37, %38, %cst_30 {dimension_numbers = #tpu.dot_dimension_numbers<[1], [1], [0], [0], [0, 0, 1, 0], [], []>} : vector<8x8xf32>, vector<8x8xf32>, vector<8x8xf32> -> vector<8x8xf32>
    %cst_31 = arith.constant 0xFF800000 : f32
    %41 = vector.broadcast %cst_31 : f32 to vector<8x8xf32>
    %42 = arith.select %6, %40, %41 : vector<8x8xi1>, vector<8x8xf32>
    %cst_32 = arith.constant dense<0xFF800000> : vector<8xf32>
    %43 = vector.multi_reduction <maximumf>, %42, %cst_32 [1] : vector<8x8xf32> to vector<8xf32>
    %44 = vector.shape_cast %43 : vector<8xf32> to vector<8x1xf32>
    %45 = vector.broadcast %44 : vector<8x1xf32> to vector<8x8xf32>
    %46 = arith.subf %42, %45 : vector<8x8xf32>
    %47 = math.exp %46 : vector<8x8xf32>
    %cst_33 = arith.constant dense<0.000000e+00> : vector<8xf32>
    %48 = vector.multi_reduction <add>, %47, %cst_33 [1] : vector<8x8xf32> to vector<8xf32>
    %49 = vector.shape_cast %48 : vector<8xf32> to vector<8x1xf32>
    %50 = tpu.reciprocal %49 : vector<8x1xf32> -> vector<8x1xf32>
    %51 = vector.broadcast %50 : vector<8x1xf32> to vector<8x8xf32>
    %52 = arith.mulf %47, %51 : vector<8x8xf32>
    %cst_34 = arith.constant dense<0.000000e+00> : vector<8x8xf32>
    %53 = tpu.matmul %52, %39, %cst_34 {dimension_numbers = #tpu.dot_dimension_numbers<[1], [0], [0], [1], [0, 0, 1, 1], [], []>} : vector<8x8xf32>, vector<8x8xf32>, vector<8x8xf32> -> vector<8x8xf32>
    %c0_35 = arith.constant 0 : index
    %c0_36 = arith.constant 0 : index
    %54 = vector.load %arg5[%c0_35, %c0_36] : memref<16x32xf32, #tpu.memory_space<vmem>>, vector<8x32xf32>
    %c8_37 = arith.constant 8 : index
    %c0_38 = arith.constant 0 : index
    %55 = vector.load %arg3[%c8_37, %c0_38] : memref<32x32xf32, #tpu.memory_space<vmem>>, vector<8x32xf32>
    %cst_39 = arith.constant dense<0.000000e+00> : vector<8x32xf32>
    %56 = tpu.matmul %53, %55, %cst_39 {dimension_numbers = #tpu.dot_dimension_numbers<[1], [0], [0], [1], [0, 0, 1, 1], [], []>} : vector<8x8xf32>, vector<8x32xf32>, vector<8x32xf32> -> vector<8x32xf32>
    %57 = arith.addf %54, %56 : vector<8x32xf32>
    %c0_40 = arith.constant 0 : index
    %c0_41 = arith.constant 0 : index
    %58 = vector.load %arg5[%c0_40, %c0_41] : memref<16x32xf32, #tpu.memory_space<vmem>>, vector<8x32xf32>
    tpu.vector_store %arg5[%c0_40, %c0_41], %57 {strides = array<i32>} : memref<16x32xf32, #tpu.memory_space<vmem>>, vector<8x32xf32>,
    %c0_42 = arith.constant 0 : index
    %c48 = arith.constant 48 : index
    %59 = vector.load %arg6[%c0_42, %c48] : memref<16x96xf32, #tpu.memory_space<vmem>>, vector<8x8xf32>
    %cst_43 = arith.constant 0.353553385 : f32
    %60 = vector.broadcast %cst_43 : f32 to vector<8x8xf32>
    %61 = arith.mulf %59, %60 : vector<8x8xf32>
    %c0_44 = arith.constant 0 : index
    %c56 = arith.constant 56 : index
    %62 = vector.load %arg6[%c0_44, %c56] : memref<16x96xf32, #tpu.memory_space<vmem>>, vector<8x8xf32>
    %c0_45 = arith.constant 0 : index
    %c64 = arith.constant 64 : index
    %63 = vector.load %arg6[%c0_45, %c64] : memref<16x96xf32, #tpu.memory_space<vmem>>, vector<8x8xf32>
    %cst_46 = arith.constant dense<0.000000e+00> : vector<8x8xf32>
    %64 = tpu.matmul %61, %62, %cst_46 {dimension_numbers = #tpu.dot_dimension_numbers<[1], [1], [0], [0], [0, 0, 1, 0], [], []>} : vector<8x8xf32>, vector<8x8xf32>, vector<8x8xf32> -> vector<8x8xf32>
    %cst_47 = arith.constant 0xFF800000 : f32
    %65 = vector.broadcast %cst_47 : f32 to vector<8x8xf32>
    %66 = arith.select %6, %64, %65 : vector<8x8xi1>, vector<8x8xf32>
    %cst_48 = arith.constant dense<0xFF800000> : vector<8xf32>
    %67 = vector.multi_reduction <maximumf>, %66, %cst_48 [1] : vector<8x8xf32> to vector<8xf32>
    %68 = vector.shape_cast %67 : vector<8xf32> to vector<8x1xf32>
    %69 = vector.broadcast %68 : vector<8x1xf32> to vector<8x8xf32>
    %70 = arith.subf %66, %69 : vector<8x8xf32>
    %71 = math.exp %70 : vector<8x8xf32>
    %cst_49 = arith.constant dense<0.000000e+00> : vector<8xf32>
    %72 = vector.multi_reduction <add>, %71, %cst_49 [1] : vector<8x8xf32> to vector<8xf32>
    %73 = vector.shape_cast %72 : vector<8xf32> to vector<8x1xf32>
    %74 = tpu.reciprocal %73 : vector<8x1xf32> -> vector<8x1xf32>
    %75 = vector.broadcast %74 : vector<8x1xf32> to vector<8x8xf32>
    %76 = arith.mulf %71, %75 : vector<8x8xf32>
    %cst_50 = arith.constant dense<0.000000e+00> : vector<8x8xf32>
    %77 = tpu.matmul %76, %63, %cst_50 {dimension_numbers = #tpu.dot_dimension_numbers<[1], [0], [0], [1], [0, 0, 1, 1], [], []>} : vector<8x8xf32>, vector<8x8xf32>, vector<8x8xf32> -> vector<8x8xf32>
    %c0_51 = arith.constant 0 : index
    %c0_52 = arith.constant 0 : index
    %78 = vector.load %arg5[%c0_51, %c0_52] : memref<16x32xf32, #tpu.memory_space<vmem>>, vector<8x32xf32>
    %c16_53 = arith.constant 16 : index
    %c0_54 = arith.constant 0 : index
    %79 = vector.load %arg3[%c16_53, %c0_54] : memref<32x32xf32, #tpu.memory_space<vmem>>, vector<8x32xf32>
    %cst_55 = arith.constant dense<0.000000e+00> : vector<8x32xf32>
    %80 = tpu.matmul %77, %79, %cst_55 {dimension_numbers = #tpu.dot_dimension_numbers<[1], [0], [0], [1], [0, 0, 1, 1], [], []>} : vector<8x8xf32>, vector<8x32xf32>, vector<8x32xf32> -> vector<8x32xf32>
    %81 = arith.addf %78, %80 : vector<8x32xf32>
    %c0_56 = arith.constant 0 : index
    %c0_57 = arith.constant 0 : index
    %82 = vector.load %arg5[%c0_56, %c0_57] : memref<16x32xf32, #tpu.memory_space<vmem>>, vector<8x32xf32>
    tpu.vector_store %arg5[%c0_56, %c0_57], %81 {strides = array<i32>} : memref<16x32xf32, #tpu.memory_space<vmem>>, vector<8x32xf32>,
    %c0_58 = arith.constant 0 : index
    %c72 = arith.constant 72 : index
    %83 = vector.load %arg6[%c0_58, %c72] : memref<16x96xf32, #tpu.memory_space<vmem>>, vector<8x8xf32>
    %cst_59 = arith.constant 0.353553385 : f32
    %84 = vector.broadcast %cst_59 : f32 to vector<8x8xf32>
    %85 = arith.mulf %83, %84 : vector<8x8xf32>
    %c0_60 = arith.constant 0 : index
    %c80 = arith.constant 80 : index
    %86 = vector.load %arg6[%c0_60, %c80] : memref<16x96xf32, #tpu.memory_space<vmem>>, vector<8x8xf32>
    %c0_61 = arith.constant 0 : index
    %c88 = arith.constant 88 : index
    %87 = vector.load %arg6[%c0_61, %c88] : memref<16x96xf32, #tpu.memory_space<vmem>>, vector<8x8xf32>
    %cst_62 = arith.constant dense<0.000000e+00> : vector<8x8xf32>
    %88 = tpu.matmul %85, %86, %cst_62 {dimension_numbers = #tpu.dot_dimension_numbers<[1], [1], [0], [0], [0, 0, 1, 0], [], []>} : vector<8x8xf32>, vector<8x8xf32>, vector<8x8xf32> -> vector<8x8xf32>
    %cst_63 = arith.constant 0xFF800000 : f32
    %89 = vector.broadcast %cst_63 : f32 to vector<8x8xf32>
    %90 = arith.select %6, %88, %89 : vector<8x8xi1>, vector<8x8xf32>
    %cst_64 = arith.constant dense<0xFF800000> : vector<8xf32>
    %91 = vector.multi_reduction <maximumf>, %90, %cst_64 [1] : vector<8x8xf32> to vector<8xf32>
    %92 = vector.shape_cast %91 : vector<8xf32> to vector<8x1xf32>
    %93 = vector.broadcast %92 : vector<8x1xf32> to vector<8x8xf32>
    %94 = arith.subf %90, %93 : vector<8x8xf32>
    %95 = math.exp %94 : vector<8x8xf32>
    %cst_65 = arith.constant dense<0.000000e+00> : vector<8xf32>
    %96 = vector.multi_reduction <add>, %95, %cst_65 [1] : vector<8x8xf32> to vector<8xf32>
    %97 = vector.shape_cast %96 : vector<8xf32> to vector<8x1xf32>
    %98 = tpu.reciprocal %97 : vector<8x1xf32> -> vector<8x1xf32>
    %99 = vector.broadcast %98 : vector<8x1xf32> to vector<8x8xf32>
    %100 = arith.mulf %95, %99 : vector<8x8xf32>
    %cst_66 = arith.constant dense<0.000000e+00> : vector<8x8xf32>
    %101 = tpu.matmul %100, %87, %cst_66 {dimension_numbers = #tpu.dot_dimension_numbers<[1], [0], [0], [1], [0, 0, 1, 1], [], []>} : vector<8x8xf32>, vector<8x8xf32>, vector<8x8xf32> -> vector<8x8xf32>
    %c0_67 = arith.constant 0 : index
    %c0_68 = arith.constant 0 : index
    %102 = vector.load %arg5[%c0_67, %c0_68] : memref<16x32xf32, #tpu.memory_space<vmem>>, vector<8x32xf32>
    %c24_69 = arith.constant 24 : index
    %c0_70 = arith.constant 0 : index
    %103 = vector.load %arg3[%c24_69, %c0_70] : memref<32x32xf32, #tpu.memory_space<vmem>>, vector<8x32xf32>
    %cst_71 = arith.constant dense<0.000000e+00> : vector<8x32xf32>
    %104 = tpu.matmul %101, %103, %cst_71 {dimension_numbers = #tpu.dot_dimension_numbers<[1], [0], [0], [1], [0, 0, 1, 1], [], []>} : vector<8x8xf32>, vector<8x32xf32>, vector<8x32xf32> -> vector<8x32xf32>
    %105 = arith.addf %102, %104 : vector<8x32xf32>
    %c0_72 = arith.constant 0 : index
    %c0_73 = arith.constant 0 : index
    %106 = vector.load %arg5[%c0_72, %c0_73] : memref<16x32xf32, #tpu.memory_space<vmem>>, vector<8x32xf32>
    tpu.vector_store %arg5[%c0_72, %c0_73], %105 {strides = array<i32>} : memref<16x32xf32, #tpu.memory_space<vmem>>, vector<8x32xf32>,
    %c8_74 = arith.constant 8 : index
    %c0_75 = arith.constant 0 : index
    %107 = vector.load %arg6[%c8_74, %c0_75] : memref<16x96xf32, #tpu.memory_space<vmem>>, vector<8x8xf32>
    %cst_76 = arith.constant 0.353553385 : f32
    %108 = vector.broadcast %cst_76 : f32 to vector<8x8xf32>
    %109 = arith.mulf %107, %108 : vector<8x8xf32>
    %c8_77 = arith.constant 8 : index
    %c8_78 = arith.constant 8 : index
    %110 = vector.load %arg6[%c8_77, %c8_78] : memref<16x96xf32, #tpu.memory_space<vmem>>, vector<8x8xf32>
    %c8_79 = arith.constant 8 : index
    %c16_80 = arith.constant 16 : index
    %111 = vector.load %arg6[%c8_79, %c16_80] : memref<16x96xf32, #tpu.memory_space<vmem>>, vector<8x8xf32>
    %cst_81 = arith.constant dense<0.000000e+00> : vector<8x8xf32>
    %112 = tpu.matmul %109, %110, %cst_81 {dimension_numbers = #tpu.dot_dimension_numbers<[1], [1], [0], [0], [0, 0, 1, 0], [], []>} : vector<8x8xf32>, vector<8x8xf32>, vector<8x8xf32> -> vector<8x8xf32>
    %cst_82 = arith.constant 0xFF800000 : f32
    %113 = vector.broadcast %cst_82 : f32 to vector<8x8xf32>
    %114 = arith.select %6, %112, %113 : vector<8x8xi1>, vector<8x8xf32>
    %cst_83 = arith.constant dense<0xFF800000> : vector<8xf32>
    %115 = vector.multi_reduction <maximumf>, %114, %cst_83 [1] : vector<8x8xf32> to vector<8xf32>
    %116 = vector.shape_cast %115 : vector<8xf32> to vector<8x1xf32>
    %117 = vector.broadcast %116 : vector<8x1xf32> to vector<8x8xf32>
    %118 = arith.subf %114, %117 : vector<8x8xf32>
    %119 = math.exp %118 : vector<8x8xf32>
    %cst_84 = arith.constant dense<0.000000e+00> : vector<8xf32>
    %120 = vector.multi_reduction <add>, %119, %cst_84 [1] : vector<8x8xf32> to vector<8xf32>
    %121 = vector.shape_cast %120 : vector<8xf32> to vector<8x1xf32>
    %122 = tpu.reciprocal %121 : vector<8x1xf32> -> vector<8x1xf32>
    %123 = vector.broadcast %122 : vector<8x1xf32> to vector<8x8xf32>
    %124 = arith.mulf %119, %123 : vector<8x8xf32>
    %cst_85 = arith.constant dense<0.000000e+00> : vector<8x8xf32>
    %125 = tpu.matmul %124, %111, %cst_85 {dimension_numbers = #tpu.dot_dimension_numbers<[1], [0], [0], [1], [0, 0, 1, 1], [], []>} : vector<8x8xf32>, vector<8x8xf32>, vector<8x8xf32> -> vector<8x8xf32>
    %c8_86 = arith.constant 8 : index
    %c0_87 = arith.constant 0 : index
    %126 = vector.load %arg5[%c8_86, %c0_87] : memref<16x32xf32, #tpu.memory_space<vmem>>, vector<8x32xf32>
    %c0_88 = arith.constant 0 : index
    %c0_89 = arith.constant 0 : index
    %127 = vector.load %arg3[%c0_88, %c0_89] : memref<32x32xf32, #tpu.memory_space<vmem>>, vector<8x32xf32>
    %cst_90 = arith.constant dense<0.000000e+00> : vector<8x32xf32>
    %128 = tpu.matmul %125, %127, %cst_90 {dimension_numbers = #tpu.dot_dimension_numbers<[1], [0], [0], [1], [0, 0, 1, 1], [], []>} : vector<8x8xf32>, vector<8x32xf32>, vector<8x32xf32> -> vector<8x32xf32>
    %129 = arith.addf %126, %128 : vector<8x32xf32>
    %c8_91 = arith.constant 8 : index
    %c0_92 = arith.constant 0 : index
    %130 = vector.load %arg5[%c8_91, %c0_92] : memref<16x32xf32, #tpu.memory_space<vmem>>, vector<8x32xf32>
    tpu.vector_store %arg5[%c8_91, %c0_92], %129 {strides = array<i32>} : memref<16x32xf32, #tpu.memory_space<vmem>>, vector<8x32xf32>,
    %c8_93 = arith.constant 8 : index
    %c24_94 = arith.constant 24 : index
    %131 = vector.load %arg6[%c8_93, %c24_94] : memref<16x96xf32, #tpu.memory_space<vmem>>, vector<8x8xf32>
    %cst_95 = arith.constant 0.353553385 : f32
    %132 = vector.broadcast %cst_95 : f32 to vector<8x8xf32>
    %133 = arith.mulf %131, %132 : vector<8x8xf32>
    %c8_96 = arith.constant 8 : index
    %c32_97 = arith.constant 32 : index
    %134 = vector.load %arg6[%c8_96, %c32_97] : memref<16x96xf32, #tpu.memory_space<vmem>>, vector<8x8xf32>
    %c8_98 = arith.constant 8 : index
    %c40_99 = arith.constant 40 : index
    %135 = vector.load %arg6[%c8_98, %c40_99] : memref<16x96xf32, #tpu.memory_space<vmem>>, vector<8x8xf32>
    %cst_100 = arith.constant dense<0.000000e+00> : vector<8x8xf32>
    %136 = tpu.matmul %133, %134, %cst_100 {dimension_numbers = #tpu.dot_dimension_numbers<[1], [1], [0], [0], [0, 0, 1, 0], [], []>} : vector<8x8xf32>, vector<8x8xf32>, vector<8x8xf32> -> vector<8x8xf32>
    %cst_101 = arith.constant 0xFF800000 : f32
    %137 = vector.broadcast %cst_101 : f32 to vector<8x8xf32>
    %138 = arith.select %6, %136, %137 : vector<8x8xi1>, vector<8x8xf32>
    %cst_102 = arith.constant dense<0xFF800000> : vector<8xf32>
    %139 = vector.multi_reduction <maximumf>, %138, %cst_102 [1] : vector<8x8xf32> to vector<8xf32>
    %140 = vector.shape_cast %139 : vector<8xf32> to vector<8x1xf32>
    %141 = vector.broadcast %140 : vector<8x1xf32> to vector<8x8xf32>
    %142 = arith.subf %138, %141 : vector<8x8xf32>
    %143 = math.exp %142 : vector<8x8xf32>
    %cst_103 = arith.constant dense<0.000000e+00> : vector<8xf32>
    %144 = vector.multi_reduction <add>, %143, %cst_103 [1] : vector<8x8xf32> to vector<8xf32>
    %145 = vector.shape_cast %144 : vector<8xf32> to vector<8x1xf32>
    %146 = tpu.reciprocal %145 : vector<8x1xf32> -> vector<8x1xf32>
    %147 = vector.broadcast %146 : vector<8x1xf32> to vector<8x8xf32>
    %148 = arith.mulf %143, %147 : vector<8x8xf32>
    %cst_104 = arith.constant dense<0.000000e+00> : vector<8x8xf32>
    %149 = tpu.matmul %148, %135, %cst_104 {dimension_numbers = #tpu.dot_dimension_numbers<[1], [0], [0], [1], [0, 0, 1, 1], [], []>} : vector<8x8xf32>, vector<8x8xf32>, vector<8x8xf32> -> vector<8x8xf32>
    %c8_105 = arith.constant 8 : index
    %c0_106 = arith.constant 0 : index
    %150 = vector.load %arg5[%c8_105, %c0_106] : memref<16x32xf32, #tpu.memory_space<vmem>>, vector<8x32xf32>
    %c8_107 = arith.constant 8 : index
    %c0_108 = arith.constant 0 : index
    %151 = vector.load %arg3[%c8_107, %c0_108] : memref<32x32xf32, #tpu.memory_space<vmem>>, vector<8x32xf32>
    %cst_109 = arith.constant dense<0.000000e+00> : vector<8x32xf32>
    %152 = tpu.matmul %149, %151, %cst_109 {dimension_numbers = #tpu.dot_dimension_numbers<[1], [0], [0], [1], [0, 0, 1, 1], [], []>} : vector<8x8xf32>, vector<8x32xf32>, vector<8x32xf32> -> vector<8x32xf32>
    %153 = arith.addf %150, %152 : vector<8x32xf32>
    %c8_110 = arith.constant 8 : index
    %c0_111 = arith.constant 0 : index
    %154 = vector.load %arg5[%c8_110, %c0_111] : memref<16x32xf32, #tpu.memory_space<vmem>>, vector<8x32xf32>
    tpu.vector_store %arg5[%c8_110, %c0_111], %153 {strides = array<i32>} : memref<16x32xf32, #tpu.memory_space<vmem>>, vector<8x32xf32>,
    %c8_112 = arith.constant 8 : index
    %c48_113 = arith.constant 48 : index
    %155 = vector.load %arg6[%c8_112, %c48_113] : memref<16x96xf32, #tpu.memory_space<vmem>>, vector<8x8xf32>
    %cst_114 = arith.constant 0.353553385 : f32
    %156 = vector.broadcast %cst_114 : f32 to vector<8x8xf32>
    %157 = arith.mulf %155, %156 : vector<8x8xf32>
    %c8_115 = arith.constant 8 : index
    %c56_116 = arith.constant 56 : index
    %158 = vector.load %arg6[%c8_115, %c56_116] : memref<16x96xf32, #tpu.memory_space<vmem>>, vector<8x8xf32>
    %c8_117 = arith.constant 8 : index
    %c64_118 = arith.constant 64 : index
    %159 = vector.load %arg6[%c8_117, %c64_118] : memref<16x96xf32, #tpu.memory_space<vmem>>, vector<8x8xf32>
    %cst_119 = arith.constant dense<0.000000e+00> : vector<8x8xf32>
    %160 = tpu.matmul %157, %158, %cst_119 {dimension_numbers = #tpu.dot_dimension_numbers<[1], [1], [0], [0], [0, 0, 1, 0], [], []>} : vector<8x8xf32>, vector<8x8xf32>, vector<8x8xf32> -> vector<8x8xf32>
    %cst_120 = arith.constant 0xFF800000 : f32
    %161 = vector.broadcast %cst_120 : f32 to vector<8x8xf32>
    %162 = arith.select %6, %160, %161 : vector<8x8xi1>, vector<8x8xf32>
    %cst_121 = arith.constant dense<0xFF800000> : vector<8xf32>
    %163 = vector.multi_reduction <maximumf>, %162, %cst_121 [1] : vector<8x8xf32> to vector<8xf32>
    %164 = vector.shape_cast %163 : vector<8xf32> to vector<8x1xf32>
    %165 = vector.broadcast %164 : vector<8x1xf32> to vector<8x8xf32>
    %166 = arith.subf %162, %165 : vector<8x8xf32>
    %167 = math.exp %166 : vector<8x8xf32>
    %cst_122 = arith.constant dense<0.000000e+00> : vector<8xf32>
    %168 = vector.multi_reduction <add>, %167, %cst_122 [1] : vector<8x8xf32> to vector<8xf32>
    %169 = vector.shape_cast %168 : vector<8xf32> to vector<8x1xf32>
    %170 = tpu.reciprocal %169 : vector<8x1xf32> -> vector<8x1xf32>
    %171 = vector.broadcast %170 : vector<8x1xf32> to vector<8x8xf32>
    %172 = arith.mulf %167, %171 : vector<8x8xf32>
    %cst_123 = arith.constant dense<0.000000e+00> : vector<8x8xf32>
    %173 = tpu.matmul %172, %159, %cst_123 {dimension_numbers = #tpu.dot_dimension_numbers<[1], [0], [0], [1], [0, 0, 1, 1], [], []>} : vector<8x8xf32>, vector<8x8xf32>, vector<8x8xf32> -> vector<8x8xf32>
    %c8_124 = arith.constant 8 : index
    %c0_125 = arith.constant 0 : index
    %174 = vector.load %arg5[%c8_124, %c0_125] : memref<16x32xf32, #tpu.memory_space<vmem>>, vector<8x32xf32>
    %c16_126 = arith.constant 16 : index
    %c0_127 = arith.constant 0 : index
    %175 = vector.load %arg3[%c16_126, %c0_127] : memref<32x32xf32, #tpu.memory_space<vmem>>, vector<8x32xf32>
    %cst_128 = arith.constant dense<0.000000e+00> : vector<8x32xf32>
    %176 = tpu.matmul %173, %175, %cst_128 {dimension_numbers = #tpu.dot_dimension_numbers<[1], [0], [0], [1], [0, 0, 1, 1], [], []>} : vector<8x8xf32>, vector<8x32xf32>, vector<8x32xf32> -> vector<8x32xf32>
    %177 = arith.addf %174, %176 : vector<8x32xf32>
    %c8_129 = arith.constant 8 : index
    %c0_130 = arith.constant 0 : index
    %178 = vector.load %arg5[%c8_129, %c0_130] : memref<16x32xf32, #tpu.memory_space<vmem>>, vector<8x32xf32>
    tpu.vector_store %arg5[%c8_129, %c0_130], %177 {strides = array<i32>} : memref<16x32xf32, #tpu.memory_space<vmem>>, vector<8x32xf32>,
    %c8_131 = arith.constant 8 : index
    %c72_132 = arith.constant 72 : index
    %179 = vector.load %arg6[%c8_131, %c72_132] : memref<16x96xf32, #tpu.memory_space<vmem>>, vector<8x8xf32>
    %cst_133 = arith.constant 0.353553385 : f32
    %180 = vector.broadcast %cst_133 : f32 to vector<8x8xf32>
    %181 = arith.mulf %179, %180 : vector<8x8xf32>
    %c8_134 = arith.constant 8 : index
    %c80_135 = arith.constant 80 : index
    %182 = vector.load %arg6[%c8_134, %c80_135] : memref<16x96xf32, #tpu.memory_space<vmem>>, vector<8x8xf32>
    %c8_136 = arith.constant 8 : index
    %c88_137 = arith.constant 88 : index
    %183 = vector.load %arg6[%c8_136, %c88_137] : memref<16x96xf32, #tpu.memory_space<vmem>>, vector<8x8xf32>
    %cst_138 = arith.constant dense<0.000000e+00> : vector<8x8xf32>
    %184 = tpu.matmul %181, %182, %cst_138 {dimension_numbers = #tpu.dot_dimension_numbers<[1], [1], [0], [0], [0, 0, 1, 0], [], []>} : vector<8x8xf32>, vector<8x8xf32>, vector<8x8xf32> -> vector<8x8xf32>
    %cst_139 = arith.constant 0xFF800000 : f32
    %185 = vector.broadcast %cst_139 : f32 to vector<8x8xf32>
    %186 = arith.select %6, %184, %185 : vector<8x8xi1>, vector<8x8xf32>
    %cst_140 = arith.constant dense<0xFF800000> : vector<8xf32>
    %187 = vector.multi_reduction <maximumf>, %186, %cst_140 [1] : vector<8x8xf32> to vector<8xf32>
    %188 = vector.shape_cast %187 : vector<8xf32> to vector<8x1xf32>
    %189 = vector.broadcast %188 : vector<8x1xf32> to vector<8x8xf32>
    %190 = arith.subf %186, %189 : vector<8x8xf32>
    %191 = math.exp %190 : vector<8x8xf32>
    %cst_141 = arith.constant dense<0.000000e+00> : vector<8xf32>
    %192 = vector.multi_reduction <add>, %191, %cst_141 [1] : vector<8x8xf32> to vector<8xf32>
    %193 = vector.shape_cast %192 : vector<8xf32> to vector<8x1xf32>
    %194 = tpu.reciprocal %193 : vector<8x1xf32> -> vector<8x1xf32>
    %195 = vector.broadcast %194 : vector<8x1xf32> to vector<8x8xf32>
    %196 = arith.mulf %191, %195 : vector<8x8xf32>
    %cst_142 = arith.constant dense<0.000000e+00> : vector<8x8xf32>
    %197 = tpu.matmul %196, %183, %cst_142 {dimension_numbers = #tpu.dot_dimension_numbers<[1], [0], [0], [1], [0, 0, 1, 1], [], []>} : vector<8x8xf32>, vector<8x8xf32>, vector<8x8xf32> -> vector<8x8xf32>
    %c8_143 = arith.constant 8 : index
    %c0_144 = arith.constant 0 : index
    %198 = vector.load %arg5[%c8_143, %c0_144] : memref<16x32xf32, #tpu.memory_space<vmem>>, vector<8x32xf32>
    %c24_145 = arith.constant 24 : index
    %c0_146 = arith.constant 0 : index
    %199 = vector.load %arg3[%c24_145, %c0_146] : memref<32x32xf32, #tpu.memory_space<vmem>>, vector<8x32xf32>
    %cst_147 = arith.constant dense<0.000000e+00> : vector<8x32xf32>
    %200 = tpu.matmul %197, %199, %cst_147 {dimension_numbers = #tpu.dot_dimension_numbers<[1], [0], [0], [1], [0, 0, 1, 1], [], []>} : vector<8x8xf32>, vector<8x32xf32>, vector<8x32xf32> -> vector<8x32xf32>
    %201 = arith.addf %198, %200 : vector<8x32xf32>
    %c8_148 = arith.constant 8 : index
    %c0_149 = arith.constant 0 : index
    %202 = vector.load %arg5[%c8_148, %c0_149] : memref<16x32xf32, #tpu.memory_space<vmem>>, vector<8x32xf32>
    tpu.vector_store %arg5[%c8_148, %c0_149], %201 {strides = array<i32>} : memref<16x32xf32, #tpu.memory_space<vmem>>, vector<8x32xf32>,
    return
  }
  func.func @transform_0(%arg0: i32) -> (i32, i32) {
    %c0_i32 = arith.constant 0 : i32
    %c0_i32_0 = arith.constant 0 : i32
    %c0_i32_1 = arith.constant 0 : i32
    return %c0_i32, %c0_i32_0 : i32, i32
  }
  func.func @transform_1(%arg0: i32) -> (i32, i32) {
    %c0_i32 = arith.constant 0 : i32
    %c0_i32_0 = arith.constant 0 : i32
    %c0_i32_1 = arith.constant 0 : i32
    return %c0_i32, %c0_i32_0 : i32, i32
  }
  func.func @transform_2(%arg0: i32) -> (i32, i32) {
    %c0_i32 = arith.constant 0 : i32
    %c0_i32_0 = arith.constant 0 : i32
    %c0_i32_1 = arith.constant 0 : i32
    return %c0_i32, %c0_i32_0 : i32, i32
  }
  func.func @transform_3(%arg0: i32) -> (i32, i32) {
    %c0_i32 = arith.constant 0 : i32
    %c0_i32_0 = arith.constant 0 : i32
    %c0_i32_1 = arith.constant 0 : i32
    return %c0_i32, %c0_i32_0 : i32, i32
  }
  func.func @transform_4(%arg0: i32) -> (i32, i32) {
    %c0_i32 = arith.constant 0 : i32
    %c0_i32_0 = arith.constant 0 : i32
    %c0_i32_1 = arith.constant 0 : i32
    return %c0_i32, %c0_i32_0 : i32, i32
  }
}

</mosaic_0001>

<bundles_post_ra>
// kernel: tpu_custom_call.1
= control target key start
LH: loop header
LB: loop body
LE: loop exit
PB: predicated region body
PF: predicated region fallthrough
CT: control target
= control target key end

     0   :  { %9 = vsyncpa [#allocation4], 0  ;;  %s2807_s0 = inlined_call_operand.hbm [shape: f32[16,32], index: 0, kind: input, shape index: {}]   ;;  %s2808_s1 = inlined_call_operand.hbm [shape: f32[32,96], index: 1, kind: input, shape index: {}]   ;;  %s2809_s2 = inlined_call_operand.hbm [shape: f32[32,32], index: 2, kind: input, shape index: {}]   ;;  %s2810_s3 = inlined_call_operand.vmem [shape: f32[1,32], index: 3, kind: input, shape index: {}]   ;;  %s2811_s4 = inlined_call_operand.hbm [shape: f32[16,32], index: 4, kind: output, shape index: {}]  }
   0x1   :  { %10 = vsyncpa [#allocation7], 0 }
   0x2   :  { %11 = vsyncpa [#allocation5], 0  ;;  %s2512_s15 = smov [#allocation6]   ;;  %s2513_s17 = smov [#allocation3]  }
   0x3   :  { %s29_s16 = sshll.u32 %s2512_s15, 4  ;;  %s17_s18 = sshll.u32 %s2513_s17, 4  ;;  %s30_s16 = int_to_ptr.vmem [resolvable:$true] %s29_s16  ;;  %s18_s18 = int_to_ptr.vmem [resolvable:$true] %s17_s18 }
   0x4   :  { %s2434_s19 = scalar_lea.vmem %s30_s16, 512  ;;  %p2439_p1 = scmp.lt.s32.totalorder %s30_s16, %s30_s16 }
   0x5   :  { %p2435_p0 = scmp.ne.s32.totalorder %s30_s16, %s2434_s19  ;;  %p2440_p2 = scmp.lt.s32.totalorder %s2434_s19, %s2434_s19 }
   0x7   :  { %p2441_p3 = por %p2440_p2, %p2439_p1 }
   0x9   :  { %p2442_p4 = pnand %p2441_p3, %p2435_p0 }
   0xb   :  { %2445 = shalt.err (!%p2442_p4)
}
   0xc   :  { %s2514_s20 = smov 128   ;;  %s2515_s21 = smov 8  }
   0xd   :  { %35 = dma.hbm_to_vmem [thread:$0]  %s2808_s1, 512, %s30_s16, [#allocation7], %s2514_s20, %s2514_s20, %s2515_s21  }
   0xe   :  { %s2454_s24 = scalar_lea.vmem %s18_s18, 256  ;;  %p2459_p6 = scmp.lt.s32.totalorder %s18_s18, %s18_s18 }
   0xf   :  { %p2455_p5 = scmp.ne.s32.totalorder %s18_s18, %s2454_s24  ;;  %p2460_p7 = scmp.lt.s32.totalorder %s2454_s24, %s2454_s24 }
  0x11   :  { %p2461_p8 = por %p2460_p7, %p2459_p6 }
  0x13   :  { %p2462_p9 = pnand %p2461_p8, %p2455_p5 }
  0x15   :  { %2465 = shalt.err (!%p2462_p9)
}
  0x16   :  { %23 = dma.hbm_to_vmem [thread:$0]  %s2807_s0, 256, %s18_s18, [#allocation4], %s2514_s20, %s2514_s20, %s2515_s21  }
  0x17   :  { %s2516_s27 = smov [#allocation8]  }
  0x18   :  { %s41_s28 = sshll.u32 %s2516_s27, 4  ;;  %s42_s28 = int_to_ptr.vmem [resolvable:$true] %s41_s28 }
  0x19   :  { %s2474_s29 = scalar_lea.vmem %s42_s28, 512  ;;  %p2479_p11 = scmp.lt.s32.totalorder %s42_s28, %s42_s28 }
  0x1a   :  { %p2475_p10 = scmp.ne.s32.totalorder %s42_s28, %s2474_s29  ;;  %p2480_p12 = scmp.lt.s32.totalorder %s2474_s29, %s2474_s29 }
  0x1c   :  { %p2481_p13 = por %p2480_p12, %p2479_p11 }
  0x1e   :  { %p2482_p0 = pnand %p2481_p13, %p2475_p10 }
  0x20   :  { %2485 = shalt.err (!%p2482_p0)
}
  0x21   :  { %47 = dma.hbm_to_vmem [thread:$0]  %s2809_s2, 512, %s42_s28, [#allocation7], %s2514_s20, %s2514_s20, %s2515_s21  }
  0x22   :  { %2506 = dma.done.wait [#allocation4], 256  }
  0x23   :  { %2507 = vsyncadd [#allocation4], 4294967040 }
  0x24   :  { %2508 = dma.done.wait [#allocation7], 1024  }
  0x25   :  { %2509 = vsyncadd [#allocation7], 4294966272  ;;  %vm65_vm0 = vcmask 261120   ;;  %v64_v0 = vld [vmem:[#allocation6 + $0x18] sm:$0xff]  ;;  %v63_v1 = vld [vmem:[#allocation6 + $0x10] sm:$0xff]  ;;  %v2517_v6 = vmov 0.0   ;;  %v150_v13 = vlaneseq }
  0x26   :  { %2244 = vmatprep.subr.mxu0 %v64_v0  ;;  %v59_v2 = vld [vmem:[#allocation3] sm:$0xff]  ;;  %v62_v3 = vld [vmem:[#allocation6 + $0x8] sm:$0xff]  ;;  %v61_v4 = vld [vmem:[#allocation6] sm:$0xff]  ;;  %2255 = vmatprep.subr.mxu1 %v2517_v6  ;;  %vm147_vm1 = vcmask 785408   ;;  %vm2518_vm2 = vmmov 0   ;;  %s2519_s0 = smov 112  }
  0x27   :  { %2245 = vmatpush3.msra.mxu0 %v64_v0  ;;  %2252 = vmatprep.mubr.msk.f32.mxu0 %vm65_vm0, %v59_v2  ;;  %v60_v5 = vld [vmem:[#allocation3 + $0x8] sm:$0xff]  ;;  %s2520_s2 = smov 120   ;;  %s2521_s5 = smov 96   ;;  %vm169_vm3 = vcmask 64512   ;;  %v151_v14 = vshrl.u32 %v150_v13, 7  ;;  %v153_v15 = vand.u32 127, %v150_v13 }
  0x28   :  { %2246 = vmatprep.subr.mxu0 %v63_v1  ;;  %2257 = vmatprep.mubr.msk.f32.mxu1 %vm2518_vm2, %v2517_v6  ;;  %s2522_s6 = smov 88   ;;  %s2523_s7 = smov 104   ;;  %v2612_v26 = vld [vmem:[#allocation8] sm:$0xff]  ;;  %v2650_v54 = vld [vmem:[#allocation8 + $0x8] sm:$0xff] }
  0x29   :  { %2247 = vmatpush3.msra.mxu0 %v63_v1  ;;  %vm2600_vm4 = vcmp.le.s32.totalorder %v153_v15, %v151_v14  ;;  %v2157_v39 = vld [vmem:[%s2810_s3] ss:$0 sm:$0xff]  ;;  %s2524_s10 = smov 72   ;;  %s2525_s11 = smov 80  }
  0x2a   :  { %2248 = vmatprep.subr.mxu0 %v62_v3  ;;  %162 = vst.msk [vmem:[#allocation9] sm:$0xff] %vm65_vm0, %v2157_v39  ;;  %163 = vst.msk [vmem:[#allocation9 + $0x8] sm:$0xff] %vm65_vm0, %v2157_v39  ;;  %s2526_s3 = smov 64   ;;  %s2527_s12 = smov 48  }
  0x2b   :  { %2249 = vmatpush3.msra.mxu0 %v62_v3  ;;  %s2528_s13 = smov 56   ;;  %s2529_s14 = smov 40  }
  0x2c   :  { %2250 = vmatprep.subr.mxu0 %v61_v4  ;;  %s2530_s15 = smov [#allocation9]  }
  0x2d   :  { %2251 = vmatpush3.msra.mxu0 %v61_v4  ;;  %s2142_s16 = sshll.u32 %s2530_s15, 4  ;;  %s2143_s16 = int_to_ptr.vmem [resolvable:$true] %s2142_s16 }
  0x2e   :  { %2253 = vmatmul.mubr.msk.f32.vlgmr.msra.gmra.mxu0 %vm65_vm0, %v60_v5  ;;  %2265 = vmatprep.subr.mxu0 %v2517_v6  ;;  %s2486_s17 = scalar_lea.vmem %s2143_s16, 256  ;;  %p2491_p2 = scmp.lt.s32.totalorder %s2143_s16, %s2143_s16 }
  0x2f   :  { %2267 = vmatprep.mubr.msk.f32.mxu0 %vm2518_vm2, %v2517_v6  ;;  %2266 = vmatpush3.msra.mxu0 %v2612_v26  ;;  %p2487_p1 = scmp.ne.s32.totalorder %s2143_s16, %s2486_s17  ;;  %p2492_p3 = scmp.lt.s32.totalorder %s2486_s17, %s2486_s17 }
  0x30   :  { %2275 = vmatprep.subr.mxu0 %v2517_v6 }
  0x31   :  { %v333_v45 = vld [vmem:[#allocation9] sm:$0xff]  ;;  %p2493_p4 = por %p2492_p3, %p2491_p2 }
  0x33   :  { %p2494_p5 = pnand %p2493_p4, %p2487_p1 }
  0xee   :  { %v2254_v7 = vpop.f32.mrf.mxu0 }
  0xef   :  { %149 = vst.msk [vmem:[#allocation2 + $0x8] sm:$0xff] %vm147_vm1, %v2254_v7  ;;  %v2670_v7 = vld [vmem:[#allocation8 + $0x10] sm:$0xff] }
  0xf0   :  { %v138_v8 = vpop.f32.mrf.mxu0 }
  0xf1   :  { %148 = vst.msk [vmem:[#allocation2] sm:$0xff] %vm147_vm1, %v138_v8 }
  0xf8   :  { %v2582_v9 = vld [vmem:[#allocation2] sm:$0xff] }
  0xf9   :  { %257 = vrot.lane.b32.xlu1 %v2582_v9, %s2519_s0  ;;  %167 = vrot.lane.b32.xlu0 %v2582_v9, %s2520_s2  ;;  %v2592_v11 = vmul.f32 0.35355338, %v2582_v9 }
  0xfd   :  { %416 = vrot.lane.b32.xlu1 %v2582_v9, %s2521_s5 }
 0x16b   :  { %v168_v10 = vpop.permute.xlu0 %167  ;;  %v258_v12 = vpop.permute.xlu1 %257 }
 0x16c   :  { %2256 = vmatpush3.xpose.msk.msra.mxu1 %vm169_vm3, %v168_v10 }
 0x16d   :  { %2260 = vmatprep.subr.mxu1 %v2517_v6 }
 0x16f   :  { %2258 = vmatmul.mubr.msk.f32.vlgmr.msra.gmra.mxu1 %vm169_vm3, %v2592_v11  ;;  %v417_v27 = vpop.permute.xlu1 %416 }
 0x170   :  { %2261 = vmatpush3.msra.mxu1 %v258_v12  ;;  %2262 = vmatprep.mubr.msk.f32.mxu1 %vm2518_vm2, %v2517_v6 }
 0x171   :  { %2270 = vmatprep.subr.mxu1 %v2517_v6 }
 0x22f   :  { %v241_v17 = vpop.f32.mrf.mxu1 }
 0x230   :  { %v245_v18 = vsel %vm2600_vm4, %v241_v17, -inf }
 0x231   :  { %v2259_v19 = vpop.f32.mrf.mxu1  ;;  %v246_v20 = vsel %vm169_vm3, %v245_v18, -inf }
 0x232   :  { %247 = vmax.xlane.f32.xlu0 %v246_v20 }
 0x248   :  { %504 = vrot.lane.b32.xlu0 %v2582_v9, %s2522_s6 }
 0x2bb   :  { %v248_v21 = vpop.xlane.xlu0 %247 }
 0x2bc   :  { %v249_v22 = vsub.f32 %v245_v18, %v248_v21 }
 0x2be   :  { %v250_v23 = vmul.f32 1.442695, %v249_v22  ;;  %v2690_v22 = vld [vmem:[#allocation2 + $0x8] sm:$0xff] }
 0x2bf   :  { %v505_v33 = vpop.permute.xlu0 %504 }
 0x2c0   :  { %2394 = vpow2.f32 %v250_v23 }
 0x2cd   :  { %v2395_v24 = vpop.eup %2394 }
 0x2ce   :  { %v252_v25 = vsel %vm169_vm3, %v2395_v24, 0.0 }
 0x2cf   :  { %253 = vadd.xlane.f32.xlu1 %v252_v25 }
 0x2e0   :  { %413 = vrot.lane.b32.xlu1 %v2592_v11, %s2523_s7 }
 0x358   :  { %v254_v28 = vpop.xlane.xlu1 %253 }
 0x359   :  { %2396 = vrcp.f32 %v254_v28 }
 0x35c   :  { %v414_v31 = vpop.permute.xlu1 %413 }
 0x366   :  { %v2397_v29 = vpop.eup %2396 }
 0x367   :  { %v256_v30 = vmul.f32 %v2397_v29, %v2395_v24 }
 0x369   :  { %2263 = vmatmul.mubr.msk.f32.vlgmr.msra.gmra.mxu1 %vm169_vm3, %v256_v30 }
 0x36a   :  { %2271 = vmatpush3.xpose.msk.msra.mxu1 %vm169_vm3, %v417_v27  ;;  %2272 = vmatprep.mubr.msk.f32.mxu1 %vm2518_vm2, %v2517_v6 }
 0x36b   :  { %2280 = vmatprep.subr.mxu1 %v2517_v6 }
 0x36d   :  { %2273 = vmatmul.mubr.msk.f32.vlgmr.msra.gmra.mxu1 %vm169_vm3, %v414_v31 }
 0x36e   :  { %2282 = vmatprep.mubr.msk.f32.mxu1 %vm2518_vm2, %v2517_v6  ;;  %2281 = vmatpush3.msra.mxu1 %v2650_v54 }
 0x36f   :  { %2290 = vmatprep.subr.mxu1 %v2517_v6 }
 0x429   :  { %v329_v32 = vpop.f32.mrf.mxu1 }
 0x42a   :  { %2268 = vmatmul.mubr.msk.f32.vlgmr.msra.gmra.mxu0 %vm169_vm3, %v329_v32  ;;  %v2699_v32 = vld [vmem:[#allocation8 + $0x18] sm:$0xff] }
 0x42b   :  { %2276 = vmatpush3.msra.mxu0 %v505_v33  ;;  %v2264_v34 = vpop.f32.mrf.mxu1  ;;  %2277 = vmatprep.mubr.msk.f32.mxu0 %vm2518_vm2, %v2517_v6 }
 0x42c   :  { %2285 = vmatprep.subr.mxu0 %v2517_v6 }
 0x42d   :  { %v488_v35 = vpop.f32.mrf.mxu1 }
 0x42e   :  { %v492_v36 = vsel %vm2600_vm4, %v488_v35, -inf }
 0x42f   :  { %v2274_v37 = vpop.f32.mrf.mxu1  ;;  %v493_v38 = vsel %vm169_vm3, %v492_v36, -inf }
 0x430   :  { %494 = vmax.xlane.f32.xlu1 %v493_v38  ;;  %v2709_v38 = vmul.f32 0.35355338, %v2690_v22 }
 0x4b9   :  { %v495_v40 = vpop.xlane.xlu1 %494 }
 0x4ba   :  { %v496_v41 = vsub.f32 %v492_v36, %v495_v40 }
 0x4bc   :  { %v497_v42 = vmul.f32 1.442695, %v496_v41 }
 0x4be   :  { %2398 = vpow2.f32 %v497_v42 }
 0x4cb   :  { %v2399_v43 = vpop.eup %2398 }
 0x4cc   :  { %v499_v44 = vsel %vm169_vm3, %v2399_v43, 0.0 }
 0x4cd   :  { %500 = vadd.xlane.f32.xlu0 %v499_v44 }
 0x4e3   :  { %663 = vrot.lane.b32.xlu0 %v2582_v9, %s2524_s10 }
 0x4e7   :  { %660 = vrot.lane.b32.xlu0 %v2592_v11, %s2525_s11 }
 0x4ea   :  { %v404_v46 = vpop.f32.mrf.mxu0 }
 0x4eb   :  { %v408_v47 = vadd.f32 %v404_v46, %v333_v45 }
 0x4ec   :  { %v2269_v48 = vpop.f32.mrf.mxu0 }
 0x4ed   :  { %409 = vst.msk [vmem:[#allocation9] sm:$0xff] %vm65_vm0, %v408_v47 }
 0x4f4   :  { %v580_v3 = vld [vmem:[#allocation9] sm:$0xff] }
 0x556   :  { %v501_v49 = vpop.xlane.xlu0 %500 }
 0x557   :  { %2400 = vrcp.f32 %v501_v49 }
 0x55a   :  { %v664_v51 = vpop.permute.xlu0 %663 }
 0x55e   :  { %v661_v53 = vpop.permute.xlu0 %660 }
 0x564   :  { %v2401_v50 = vpop.eup %2400 }
 0x565   :  { %v503_v52 = vmul.f32 %v2401_v50, %v2399_v43 }
 0x567   :  { %2278 = vmatmul.mubr.msk.f32.vlgmr.msra.gmra.mxu0 %vm169_vm3, %v503_v52 }
 0x568   :  { %2286 = vmatpush3.xpose.msk.msra.mxu0 %vm169_vm3, %v664_v51  ;;  %2287 = vmatprep.mubr.msk.f32.mxu0 %vm2518_vm2, %v2517_v6 }
 0x569   :  { %2295 = vmatprep.subr.mxu0 %v2517_v6 }
 0x56b   :  { %2288 = vmatmul.mubr.msk.f32.vlgmr.msra.gmra.mxu0 %vm169_vm3, %v661_v53 }
 0x56c   :  { %2297 = vmatprep.mubr.msk.f32.mxu0 %vm2518_vm2, %v2517_v6  ;;  %2296 = vmatpush3.msra.mxu0 %v2670_v7 }
 0x56d   :  { %2305 = vmatprep.subr.mxu0 %v2517_v6 }
 0x627   :  { %v576_v55 = vpop.f32.mrf.mxu0 }
 0x628   :  { %2283 = vmatmul.mubr.msk.f32.vlgmr.msra.gmra.mxu1 %vm169_vm3, %v576_v55 }
 0x629   :  { %v2279_v56 = vpop.f32.mrf.mxu0  ;;  %2292 = vmatprep.mubr.msk.f32.mxu1 %vm2518_vm2, %v2517_v6 }
 0x62b   :  { %v735_v57 = vpop.f32.mrf.mxu0 }
 0x62c   :  { %v739_v58 = vsel %vm2600_vm4, %v735_v57, -inf }
 0x62d   :  { %v2289_v59 = vpop.f32.mrf.mxu0  ;;  %v740_v60 = vsel %vm169_vm3, %v739_v58, -inf }
 0x62e   :  { %741 = vmax.xlane.f32.xlu1 %v740_v60 }
 0x63f   :  { %751 = vrot.lane.b32.xlu1 %v2582_v9, %s2526_s3 }
 0x643   :  { %910 = vrot.lane.b32.xlu1 %v2582_v9, %s2527_s12 }
 0x647   :  { %907 = vrot.lane.b32.xlu1 %v2592_v11, %s2528_s13 }
 0x6b7   :  { %v742_v61 = vpop.xlane.xlu1 %741 }
 0x6b8   :  { %v743_v62 = vsub.f32 %v739_v58, %v742_v61 }
 0x6ba   :  { %v744_v63 = vmul.f32 1.442695, %v743_v62 }
 0x6bb   :  { %v752_v0 = vpop.permute.xlu1 %751 }
 0x6bc   :  { %2402 = vpow2.f32 %v744_v63  ;;  %2291 = vmatpush3.msra.mxu1 %v752_v0 }
 0x6bd   :  { %2300 = vmatprep.subr.mxu1 %v2517_v6 }
 0x6bf   :  { %v911_v12 = vpop.permute.xlu1 %910 }
 0x6c9   :  { %v2403_v1 = vpop.eup %2402 }
 0x6ca   :  { %v746_v2 = vsel %vm169_vm3, %v2403_v1, 0.0 }
 0x6cb   :  { %747 = vadd.xlane.f32.xlu0 %v746_v2 }
 0x6e1   :  { %998 = vrot.lane.b32.xlu0 %v2582_v9, %s2529_s14  ;;  %v908_v9 = vpop.permute.xlu1 %907 }
 0x6e8   :  { %v651_v4 = vpop.f32.mrf.mxu1 }
 0x6e9   :  { %v655_v5 = vadd.f32 %v651_v4, %v580_v3 }
 0x6ea   :  { %v2284_v8 = vpop.f32.mrf.mxu1 }
 0x6eb   :  { %656 = vst.msk [vmem:[#allocation9] sm:$0xff] %vm65_vm0, %v655_v5 }
 0x6f2   :  { %v827_v29 = vld [vmem:[#allocation9] sm:$0xff] }
 0x754   :  { %v748_v10 = vpop.xlane.xlu0 %747 }
 0x755   :  { %2404 = vrcp.f32 %v748_v10  ;;  %v1319_v10 = vld [vmem:[#allocation9 + $0x8] sm:$0xff] }
 0x758   :  { %v999_v15 = vpop.permute.xlu0 %998 }
 0x762   :  { %v2405_v11 = vpop.eup %2404 }
 0x763   :  { %v750_v13 = vmul.f32 %v2405_v11, %v2403_v1 }
 0x765   :  { %2293 = vmatmul.mubr.msk.f32.vlgmr.msra.gmra.mxu1 %vm169_vm3, %v750_v13 }
 0x766   :  { %2301 = vmatpush3.xpose.msk.msra.mxu1 %vm169_vm3, %v911_v12  ;;  %2302 = vmatprep.mubr.msk.f32.mxu1 %vm2518_vm2, %v2517_v6 }
 0x767   :  { %2310 = vmatprep.subr.mxu1 %v2517_v6 }
 0x769   :  { %2303 = vmatmul.mubr.msk.f32.vlgmr.msra.gmra.mxu1 %vm169_vm3, %v908_v9 }
 0x76a   :  { %2312 = vmatprep.mubr.msk.f32.mxu1 %vm2518_vm2, %v2517_v6  ;;  %2311 = vmatpush3.msra.mxu1 %v2699_v32 }
 0x76b   :  { %2320 = vmatprep.subr.mxu1 %v2517_v6 }
 0x825   :  { %v823_v14 = vpop.f32.mrf.mxu1 }
 0x826   :  { %2298 = vmatmul.mubr.msk.f32.vlgmr.msra.gmra.mxu0 %vm169_vm3, %v823_v14 }
 0x827   :  { %2306 = vmatpush3.msra.mxu0 %v999_v15  ;;  %v2294_v17 = vpop.f32.mrf.mxu1  ;;  %2307 = vmatprep.mubr.msk.f32.mxu0 %vm2518_vm2, %v2517_v6 }
 0x828   :  { %2315 = vmatprep.subr.mxu0 %v2517_v6 }
 0x829   :  { %v982_v18 = vpop.f32.mrf.mxu1 }
 0x82a   :  { %v986_v19 = vsel %vm2600_vm4, %v982_v18, -inf }
 0x82b   :  { %v2304_v20 = vpop.f32.mrf.mxu1  ;;  %v987_v21 = vsel %vm169_vm3, %v986_v19, -inf }
 0x82c   :  { %988 = vmax.xlane.f32.xlu1 %v987_v21 }
 0x83d   :  { %1243 = vrot.lane.b32.xlu1 %v2690_v22, %s2519_s0 }
 0x841   :  { %1402 = vrot.lane.b32.xlu1 %v2690_v22, %s2521_s5 }
 0x8b5   :  { %v989_v23 = vpop.xlane.xlu1 %988 }
 0x8b6   :  { %v990_v24 = vsub.f32 %v986_v19, %v989_v23 }
 0x8b8   :  { %v991_v25 = vmul.f32 1.442695, %v990_v24 }
 0x8b9   :  { %v1244_v40 = vpop.permute.xlu1 %1243 }
 0x8ba   :  { %2406 = vpow2.f32 %v991_v25 }
 0x8bd   :  { %v1403_v55 = vpop.permute.xlu1 %1402 }
 0x8c7   :  { %v2407_v27 = vpop.eup %2406 }
 0x8c8   :  { %v993_v28 = vsel %vm169_vm3, %v2407_v27, 0.0 }
 0x8c9   :  { %994 = vadd.xlane.f32.xlu0 %v993_v28 }
 0x8df   :  { %1154 = vrot.lane.b32.xlu0 %v2690_v22, %s2520_s2 }
 0x8e6   :  { %v898_v30 = vpop.f32.mrf.mxu0 }
 0x8e7   :  { %v902_v31 = vadd.f32 %v898_v30, %v827_v29 }
 0x8e8   :  { %v2299_v33 = vpop.f32.mrf.mxu0 }
 0x8e9   :  { %903 = vst.msk [vmem:[#allocation9] sm:$0xff] %vm65_vm0, %v902_v31 }
 0x8f0   :  { %v1074_v50 = vld [vmem:[#allocation9] sm:$0xff] }
 0x952   :  { %v995_v34 = vpop.xlane.xlu0 %994 }
 0x953   :  { %2408 = vrcp.f32 %v995_v34 }
 0x956   :  { %v1155_v37 = vpop.permute.xlu0 %1154 }
 0x960   :  { %v2409_v35 = vpop.eup %2408 }
 0x961   :  { %v997_v36 = vmul.f32 %v2409_v35, %v2407_v27 }
 0x963   :  { %2308 = vmatmul.mubr.msk.f32.vlgmr.msra.gmra.mxu0 %vm169_vm3, %v997_v36 }
 0x964   :  { %2316 = vmatpush3.xpose.msk.msra.mxu0 %vm169_vm3, %v1155_v37  ;;  %2317 = vmatprep.mubr.msk.f32.mxu0 %vm2518_vm2, %v2517_v6 }
 0x965   :  { %2325 = vmatprep.subr.mxu0 %v2517_v6 }
 0x967   :  { %2318 = vmatmul.mubr.msk.f32.vlgmr.msra.gmra.mxu0 %vm169_vm3, %v2709_v38 }
 0x968   :  { %2326 = vmatpush3.msra.mxu0 %v2612_v26  ;;  %2327 = vmatprep.mubr.msk.f32.mxu0 %vm2518_vm2, %v2517_v6 }
 0x969   :  { %2335 = vmatprep.subr.mxu0 %v2517_v6 }
 0xa23   :  { %v1070_v39 = vpop.f32.mrf.mxu0 }
 0xa24   :  { %2313 = vmatmul.mubr.msk.f32.vlgmr.msra.gmra.mxu1 %vm169_vm3, %v1070_v39 }
 0xa25   :  { %2321 = vmatpush3.msra.mxu1 %v1244_v40  ;;  %v2309_v41 = vpop.f32.mrf.mxu0  ;;  %2322 = vmatprep.mubr.msk.f32.mxu1 %vm2518_vm2, %v2517_v6 }
 0xa26   :  { %2330 = vmatprep.subr.mxu1 %v2517_v6 }
 0xa27   :  { %v1227_v42 = vpop.f32.mrf.mxu0 }
 0xa28   :  { %v1231_v26 = vsel %vm2600_vm4, %v1227_v42, -inf }
 0xa29   :  { %v2319_v43 = vpop.f32.mrf.mxu0  ;;  %v1232_v44 = vsel %vm169_vm3, %v1231_v26, -inf }
 0xa2a   :  { %1233 = vmax.xlane.f32.xlu0 %v1232_v44 }
 0xa40   :  { %1490 = vrot.lane.b32.xlu0 %v2690_v22, %s2522_s6 }
 0xab3   :  { %v1234_v45 = vpop.xlane.xlu0 %1233 }
 0xab4   :  { %v1235_v46 = vsub.f32 %v1231_v26, %v1234_v45 }
 0xab6   :  { %v1236_v47 = vmul.f32 1.442695, %v1235_v46 }
 0xab7   :  { %v1491_v61 = vpop.permute.xlu0 %1490 }
 0xab8   :  { %2410 = vpow2.f32 %v1236_v47 }
 0xac5   :  { %v2411_v48 = vpop.eup %2410 }
 0xac6   :  { %v1238_v49 = vsel %vm169_vm3, %v2411_v48, 0.0 }
 0xac7   :  { %1239 = vadd.xlane.f32.xlu1 %v1238_v49 }
 0xad8   :  { %1399 = vrot.lane.b32.xlu1 %v2709_v38, %s2523_s7 }
 0xae4   :  { %v1145_v51 = vpop.f32.mrf.mxu1 }
 0xae5   :  { %v1149_v52 = vadd.f32 %v1145_v51, %v1074_v50 }
 0xae6   :  { %v2314_v53 = vpop.f32.mrf.mxu1 }
 0xae7   :  { %1150 = vst.msk [vmem:[#allocation9] sm:$0xff] %vm65_vm0, %v1149_v52 }
 0xb50   :  { %v1240_v56 = vpop.xlane.xlu1 %1239 }
 0xb51   :  { %2412 = vrcp.f32 %v1240_v56 }
 0xb54   :  { %v1400_v59 = vpop.permute.xlu1 %1399 }
 0xb5e   :  { %v2413_v57 = vpop.eup %2412 }
 0xb5f   :  { %v1242_v58 = vmul.f32 %v2413_v57, %v2411_v48 }
 0xb61   :  { %2323 = vmatmul.mubr.msk.f32.vlgmr.msra.gmra.mxu1 %vm169_vm3, %v1242_v58 }
 0xb62   :  { %2331 = vmatpush3.xpose.msk.msra.mxu1 %vm169_vm3, %v1403_v55  ;;  %2332 = vmatprep.mubr.msk.f32.mxu1 %vm2518_vm2, %v2517_v6 }
 0xb63   :  { %2340 = vmatprep.subr.mxu1 %v2517_v6 }
 0xb65   :  { %2333 = vmatmul.mubr.msk.f32.vlgmr.msra.gmra.mxu1 %vm169_vm3, %v1400_v59 }
 0xb66   :  { %2341 = vmatpush3.msra.mxu1 %v2650_v54  ;;  %2342 = vmatprep.mubr.msk.f32.mxu1 %vm2518_vm2, %v2517_v6 }
 0xb67   :  { %2350 = vmatprep.subr.mxu1 %v2517_v6 }
 0xc21   :  { %v1315_v60 = vpop.f32.mrf.mxu1 }
 0xc22   :  { %2328 = vmatmul.mubr.msk.f32.vlgmr.msra.gmra.mxu0 %vm169_vm3, %v1315_v60 }
 0xc23   :  { %2336 = vmatpush3.msra.mxu0 %v1491_v61  ;;  %v2324_v62 = vpop.f32.mrf.mxu1  ;;  %2337 = vmatprep.mubr.msk.f32.mxu0 %vm2518_vm2, %v2517_v6 }
 0xc24   :  { %2345 = vmatprep.subr.mxu0 %v2517_v6 }
 0xc25   :  { %v1474_v63 = vpop.f32.mrf.mxu1 }
 0xc26   :  { %v1478_v54 = vsel %vm2600_vm4, %v1474_v63, -inf }
 0xc27   :  { %v2334_v0 = vpop.f32.mrf.mxu1  ;;  %v1479_v1 = vsel %vm169_vm3, %v1478_v54, -inf }
 0xc28   :  { %1480 = vmax.xlane.f32.xlu1 %v1479_v1 }
 0xc39   :  { %1737 = vrot.lane.b32.xlu1 %v2690_v22, %s2526_s3 }
 0xc3d   :  { %1896 = vrot.lane.b32.xlu1 %v2690_v22, %s2527_s12 }
 0xcb1   :  { %v1481_v2 = vpop.xlane.xlu1 %1480 }
 0xcb2   :  { %v1482_v3 = vsub.f32 %v1478_v54, %v1481_v2 }
 0xcb4   :  { %v1483_v4 = vmul.f32 1.442695, %v1482_v3 }
 0xcb5   :  { %v1738_v20 = vpop.permute.xlu1 %1737 }
 0xcb6   :  { %2414 = vpow2.f32 %v1483_v4 }
 0xcb9   :  { %v1897_v37 = vpop.permute.xlu1 %1896 }
 0xcc3   :  { %v2415_v5 = vpop.eup %2414 }
 0xcc4   :  { %v1485_v8 = vsel %vm169_vm3, %v2415_v5, 0.0 }
 0xcc5   :  { %1486 = vadd.xlane.f32.xlu0 %v1485_v8 }
 0xcdb   :  { %1649 = vrot.lane.b32.xlu0 %v2690_v22, %s2524_s10 }
 0xcdf   :  { %1646 = vrot.lane.b32.xlu0 %v2709_v38, %s2525_s11 }
 0xce2   :  { %v1390_v11 = vpop.f32.mrf.mxu0 }
 0xce3   :  { %v1394_v12 = vadd.f32 %v1390_v11, %v1319_v10 }
 0xce4   :  { %v2329_v13 = vpop.f32.mrf.mxu0 }
 0xce5   :  { %1395 = vst.msk [vmem:[#allocation9 + $0x8] sm:$0xff] %vm65_vm0, %v1394_v12 }
 0xcec   :  { %v1566_v33 = vld [vmem:[#allocation9 + $0x8] sm:$0xff] }
 0xd4e   :  { %v1487_v9 = vpop.xlane.xlu0 %1486 }
 0xd4f   :  { %2416 = vrcp.f32 %v1487_v9 }
 0xd52   :  { %v1650_v15 = vpop.permute.xlu0 %1649 }
 0xd56   :  { %v1647_v18 = vpop.permute.xlu0 %1646 }
 0xd5c   :  { %v2417_v14 = vpop.eup %2416 }
 0xd5d   :  { %v1489_v17 = vmul.f32 %v2417_v14, %v2415_v5 }
 0xd5f   :  { %2338 = vmatmul.mubr.msk.f32.vlgmr.msra.gmra.mxu0 %vm169_vm3, %v1489_v17 }
 0xd60   :  { %2346 = vmatpush3.xpose.msk.msra.mxu0 %vm169_vm3, %v1650_v15  ;;  %2347 = vmatprep.mubr.msk.f32.mxu0 %vm2518_vm2, %v2517_v6 }
 0xd61   :  { %2355 = vmatprep.subr.mxu0 %v2517_v6 }
 0xd63   :  { %2348 = vmatmul.mubr.msk.f32.vlgmr.msra.gmra.mxu0 %vm169_vm3, %v1647_v18 }
 0xd64   :  { %2356 = vmatpush3.msra.mxu0 %v2670_v7  ;;  %2357 = vmatprep.mubr.msk.f32.mxu0 %vm2518_vm2, %v2517_v6 }
 0xd65   :  { %2365 = vmatprep.subr.mxu0 %v2517_v6 }
 0xe1f   :  { %v1562_v19 = vpop.f32.mrf.mxu0 }
 0xe20   :  { %2343 = vmatmul.mubr.msk.f32.vlgmr.msra.gmra.mxu1 %vm169_vm3, %v1562_v19 }
 0xe21   :  { %2351 = vmatpush3.msra.mxu1 %v1738_v20  ;;  %v2339_v21 = vpop.f32.mrf.mxu0  ;;  %2352 = vmatprep.mubr.msk.f32.mxu1 %vm2518_vm2, %v2517_v6 }
 0xe22   :  { %2360 = vmatprep.subr.mxu1 %v2517_v6 }
 0xe23   :  { %v1721_v23 = vpop.f32.mrf.mxu0 }
 0xe24   :  { %v1725_v7 = vsel %vm2600_vm4, %v1721_v23, -inf }
 0xe25   :  { %v2349_v24 = vpop.f32.mrf.mxu0  ;;  %v1726_v25 = vsel %vm169_vm3, %v1725_v7, -inf }
 0xe26   :  { %1727 = vmax.xlane.f32.xlu0 %v1726_v25 }
 0xeaf   :  { %v1728_v27 = vpop.xlane.xlu0 %1727 }
 0xeb0   :  { %v1729_v28 = vsub.f32 %v1725_v7, %v1728_v27 }
 0xeb2   :  { %v1730_v29 = vmul.f32 1.442695, %v1729_v28 }
 0xeb4   :  { %2418 = vpow2.f32 %v1730_v29 }
 0xec1   :  { %v2419_v30 = vpop.eup %2418 }
 0xec2   :  { %v1732_v31 = vsel %vm169_vm3, %v2419_v30, 0.0 }
 0xec3   :  { %1733 = vadd.xlane.f32.xlu1 %v1732_v31 }
 0xed4   :  { %1893 = vrot.lane.b32.xlu1 %v2709_v38, %s2528_s13 }
 0xee0   :  { %v1637_v34 = vpop.f32.mrf.mxu1 }
 0xee1   :  { %v1641_v35 = vadd.f32 %v1637_v34, %v1566_v33 }
 0xee2   :  { %v2344_v36 = vpop.f32.mrf.mxu1 }
 0xee3   :  { %1642 = vst.msk [vmem:[#allocation9 + $0x8] sm:$0xff] %vm65_vm0, %v1641_v35 }
 0xf4c   :  { %v1734_v39 = vpop.xlane.xlu1 %1733 }
 0xf4d   :  { %2420 = vrcp.f32 %v1734_v39 }
 0xf50   :  { %v1894_v38 = vpop.permute.xlu1 %1893 }
 0xf5a   :  { %v2421_v40 = vpop.eup %2420 }
 0xf5b   :  { %v1736_v41 = vmul.f32 %v2421_v40, %v2419_v30 }
 0xf5d   :  { %2353 = vmatmul.mubr.msk.f32.vlgmr.msra.gmra.mxu1 %vm169_vm3, %v1736_v41 }
 0xf5e   :  { %2361 = vmatpush3.xpose.msk.msra.mxu1 %vm169_vm3, %v1897_v37  ;;  %2362 = vmatprep.mubr.msk.f32.mxu1 %vm2518_vm2, %v2517_v6 }
 0xf5f   :  { %2370 = vmatprep.subr.mxu1 %v2517_v6 }
 0xf61   :  { %2363 = vmatmul.mubr.msk.f32.vlgmr.msra.gmra.mxu1 %vm169_vm3, %v1894_v38 }
 0xf62   :  { %2371 = vmatpush3.msra.mxu1 %v2699_v32  ;;  %2372 = vmatprep.mubr.msk.f32.mxu1 %vm2518_vm2, %v2517_v6 }
0x101d   :  { %v1809_v42 = vpop.f32.mrf.mxu1 }
0x101e   :  { %2358 = vmatmul.mubr.msk.f32.vlgmr.msra.gmra.mxu0 %vm169_vm3, %v1809_v42 }
0x101f   :  { %v2354_v26 = vpop.f32.mrf.mxu1  ;;  %2367 = vmatprep.mubr.msk.f32.mxu0 %vm2518_vm2, %v2517_v6  ;;  %v1813_v6 = vld [vmem:[#allocation9 + $0x8] sm:$0xff] }
0x1021   :  { %v1968_v43 = vpop.f32.mrf.mxu1 }
0x1022   :  { %v1972_v44 = vsel %vm2600_vm4, %v1968_v43, -inf }
0x1023   :  { %v2364_v45 = vpop.f32.mrf.mxu1  ;;  %v1973_v46 = vsel %vm169_vm3, %v1972_v44, -inf }
0x1024   :  { %1974 = vmax.xlane.f32.xlu1 %v1973_v46 }
0x10ad   :  { %v1975_v47 = vpop.xlane.xlu1 %1974 }
0x10ae   :  { %v1976_v32 = vsub.f32 %v1972_v44, %v1975_v47 }
0x10b0   :  { %v1977_v48 = vmul.f32 1.442695, %v1976_v32 }
0x10b2   :  { %2422 = vpow2.f32 %v1977_v48 }
0x10bf   :  { %v2423_v49 = vpop.eup %2422 }
0x10c0   :  { %v1979_v50 = vsel %vm169_vm3, %v2423_v49, 0.0 }
0x10c1   :  { %1980 = vadd.xlane.f32.xlu0 %v1979_v50 }
0x10d7   :  { %1984 = vrot.lane.b32.xlu0 %v2690_v22, %s2529_s14 }
0x10de   :  { %v1884_v51 = vpop.f32.mrf.mxu0 }
0x10df   :  { %v1888_v52 = vadd.f32 %v1884_v51, %v1813_v6 }
0x10e0   :  { %v2359_v16 = vpop.f32.mrf.mxu0 }
0x10e1   :  { %1889 = vst.msk [vmem:[#allocation9 + $0x8] sm:$0xff] %vm65_vm0, %v1888_v52 }
0x10e8   :  { %v2060_v22 = vld [vmem:[#allocation9 + $0x8] sm:$0xff] }
0x114a   :  { %v1981_v53 = vpop.xlane.xlu0 %1980 }
0x114b   :  { %2424 = vrcp.f32 %v1981_v53 }
0x114e   :  { %v1985_v55 = vpop.permute.xlu0 %1984 }
0x114f   :  { %2366 = vmatpush3.msra.mxu0 %v1985_v55 }
0x1158   :  { %v2425_v56 = vpop.eup %2424 }
0x1159   :  { %v1983_v57 = vmul.f32 %v2425_v56, %v2423_v49 }
0x115b   :  { %2368 = vmatmul.mubr.msk.f32.vlgmr.msra.gmra.mxu0 %vm169_vm3, %v1983_v57 }
0x121b   :  { %v2056_v58 = vpop.f32.mrf.mxu0 }
0x121c   :  { %2373 = vmatmul.mubr.msk.f32.vlgmr.msra.gmra.mxu1 %vm169_vm3, %v2056_v58 }
0x121d   :  { %v2369_v59 = vpop.f32.mrf.mxu0 }
0x12dc   :  { %v2131_v60 = vpop.f32.mrf.mxu1 }
0x12dd   :  { %v2135_v61 = vadd.f32 %v2131_v60, %v2060_v22 }
0x12de   :  { %v2374_v62 = vpop.f32.mrf.mxu1 }
0x12df   :  { %2136 = vst.msk [vmem:[#allocation9 + $0x8] sm:$0xff] %vm65_vm0, %v2135_v61 }
0x12e0   :  { %2497 = shalt.err (!%p2494_p5)
}
0x12e1   :  { %2148 = dma.vmem_to_hbm [thread:$0]  %s2143_s16, 256, %s2811_s4, [#allocation5], %s2514_s20, %s2514_s20, %s2515_s21  }
0x12e2   :  { %2510 = dma.done.wait [#allocation5], 256  }
0x12e3   :  { %2511 = vsyncadd [#allocation5], 4294967040 }
0x12e4   :  { %2152 = vsyncpa [#allocation4], 1 }
0x12e5   :  { %2153 = vsyncpa [#allocation7], 1 }
0x12e6   :  { %2154 = vsyncpa [#allocation5], 1 }

</bundles_post_ra>
